<compile_context>
chip_gen: v7x
topology: tpu7x:2x2x1
jax: 0.10.0
libtpu: 0.0.40
codegen_flags: <defaults>
</compile_context>

<pallas_src>
import functools

import numpy as np
import jax
import jax.numpy as jnp
from jax.experimental import pallas as pl
from jax.experimental.pallas import tpu as pltpu

D_IN = 30  # feature width (also output width)

# Packed parameter layout (PyTorch weight layout W: (out, in); bias in col 30).
# Row starts are 8-aligned (sublane-aligned ref slices). Layers 3 & 4 of the
# module (Linear(10,6) -> Linear(6,10), no activation between them) are fused
# into one (10,10) matmul; the ReLU that follows Linear(6,10) is applied to the
# fused output.
#            row0  out  in  relu-after
_LAYERS = (
    (0,    20,  30,  True),    # encoder Linear(30,20) + ReLU
    (24,   10,  20,  True),    # encoder Linear(20,10) + ReLU
    (40,   10,  10,  True),    # fused Linear(10,6) @ Linear(6,10) + ReLU
    (56,   20,  10,  True),    # decoder Linear(10,20) + ReLU
    (80,   30,  20,  False),   # decoder Linear(20,30)
)
_PACK_ROWS = 112
_PACK_COLS = 31
_BIAS_COL = 30


def _round_up(n, m):
    return -(-n // m) * m


def _ae_kernel(x_ref, p_ref, o_ref):
    # x_ref / o_ref: (tb, 30) blocks of the (B_pad, 30) activations.
    # p_ref: (112, 31) packed params; constant index_map -> stays VMEM-resident.
    #
    # Transpose to batch-on-lanes so every intermediate is lane-dense: feature
    # dims (30/20/10) sit on sublanes, the batch tile sits on the 128-wide lanes.
    h = jnp.transpose(x_ref[...].astype(jnp.float32))            # (30, tb)

    for r0, out_d, in_d, relu in _LAYERS:
        w = p_ref[r0:r0 + out_d, 0:in_d]                          # (out, in) static ref view
        b = p_ref[r0:r0 + out_d, _BIAS_COL:_BIAS_COL + 1]         # (out, 1) -> lane broadcast
        h = jnp.dot(w, h, preferred_element_type=jnp.float32) + b
        if relu:
            h = jnp.maximum(h, 0.0)

    o_ref[...] = jnp.transpose(h).astype(o_ref.dtype)             # (tb, 30)


def pack_params(params):
    """One-time host-side packing (hoist out of the per-call hot path).

    params: list of 6 (W, b) pairs in PyTorch layout, W: (out, in), b: (out,).
    Fuses layers 3 & 4 (no activation between them) and packs everything into a
    single (112, 31) float32 array matching _LAYERS."""
    ps = [(np.asarray(w, np.float32), np.asarray(b, np.float32)) for w, b in params]
    (w1, b1), (w2, b2), (w3, b3), (w4, b4), (w5, b5), (w6, b6) = ps
    w34 = w4 @ w3                 # (10, 6) @ (6, 10) -> (10, 10)
    b34 = w4 @ b3 + b4            # (10,)
    fused = [(w1, b1), (w2, b2), (w34, b34), (w5, b5), (w6, b6)]

    packed = np.zeros((_PACK_ROWS, _PACK_COLS), np.float32)
    for (w, b), (r0, out_d, in_d, _) in zip(fused, _LAYERS):
        assert w.shape == (out_d, in_d) and b.shape == (out_d,)
        packed[r0:r0 + out_d, 0:in_d] = w
        packed[r0:r0 + out_d, _BIAS_COL] = b
    return jnp.asarray(packed)


@functools.partial(jax.jit, static_argnames=("tile_b",))
def breast_cancer_ae_forward(x, packed_params, *, tile_b=8192):
    """x: any shape with prod % 30 == 0 (matches x.view(-1, 30)).
    packed_params: result of pack_params(params). Returns (B, 30) in x.dtype."""
    x2 = x.reshape(-1, D_IN)                     # x.view(-1, 30)
    B = x2.shape[0]

    # Batch tile: multiple of 128 (it is the lane dim inside the kernel), clamped
    # so large batches still give >= 4 grid steps (keeps both v7x TensorCores
    # busy and DMA pipelined behind compute on all generations).
    tb = max(128, min(_round_up(tile_b, 128), _round_up(-(-B // 4), 128)))
    B_pad = _round_up(B, tb)
    if B_pad != B:
        x2 = jnp.pad(x2, ((0, B_pad - B), (0, 0)))

    out = pl.pallas_call(
        _ae_kernel,
        out_shape=jax.ShapeDtypeStruct((B_pad, D_IN), x2.dtype),
        grid=(B_pad // tb,),
        in_specs=[
            pl.BlockSpec((tb, D_IN), lambda i: (i, 0)),                   # activations
            pl.BlockSpec((_PACK_ROWS, _PACK_COLS), lambda i: (0, 0)),     # resident params
        ],
        out_specs=pl.BlockSpec((tb, D_IN), lambda i: (i, 0)),
        compiler_params=pltpu.CompilerParams(
            dimension_semantics=("parallel",),
            vmem_limit_bytes=48 * 1024 * 1024,
        ),
    )(x2, packed_params)

    return out[:B] if B_pad != B else out


def init_params(key):
    """Deterministic params in PyTorch layout: W: (out, in), b: (out,)."""
    dims = [30, 20, 10, 6, 10, 20, 30]
    params = []
    for li in range(len(dims) - 1):
        d_in, d_out = dims[li], dims[li + 1]
        key, kw, kb = jax.random.split(key, 3)
        bound = 1.0 / (d_in ** 0.5)
        w = jax.random.uniform(kw, (d_out, d_in), jnp.float32, -bound, bound)
        b = jax.random.uniform(kb, (d_out,), jnp.float32, -bound, bound)
        params.append((w, b))
    return params


def _reference_forward(x, params):
    """Pure numpy (float64) reference of the un-fused PyTorch forward."""
    h = np.asarray(x, np.float64).reshape(-1, D_IN)
    for idx, (w, b) in enumerate(params):
        w = np.asarray(w, np.float64)
        b = np.asarray(b, np.float64)
        h = h @ w.T + b
        if idx not in (2, 5):   # no ReLU after Linear(10,6) / Linear(20,30)
            h = np.maximum(h, 0.0)
    return h


if __name__ == "__main__":
    key = jax.random.PRNGKey(0)
    kx, kp = jax.random.split(key)

    B = 16
    x = jax.random.normal(kx, (B, D_IN), jnp.float32)
    params = init_params(kp)

    packed = pack_params(params)            # one-time packing, outside the hot path
    out = breast_cancer_ae_forward(x, packed)
    out = jax.block_until_ready(out)

    ref = _reference_forward(np.asarray(x), params)
    assert out.shape == (B, D_IN)
    assert out.dtype == x.dtype
    assert np.allclose(np.asarray(out, np.float64), ref, atol=1e-3, rtol=1e-3), \
        "mismatch vs reference"

    print("KERNEL_OK")
</pallas_src>

<mosaic_0001>
module attributes {stable_mosaic.version = 11 : i64} {
  func.func @_ae_kernel(%arg0: i32, %arg1: memref<128x30xf32, #tpu.memory_space<vmem>>, %arg2: memref<112x31xf32, #tpu.memory_space<vmem>>, %arg3: memref<128x30xf32, #tpu.memory_space<vmem>>) attributes {dimension_semantics = [#tpu.dimension_semantics<parallel>], iteration_bounds = array<i64: 1>, scalar_prefetch = 0 : i64, scratch_operands = 0 : i64, tpu.core_type = #tpu.core_type<tc>, window_params = [{transform_indices = @transform_0, window_bounds = array<i64: 128, 30>}, {pipeline_mode = #tpu.pipeline_mode<synchronous>, transform_indices = @transform_1, window_bounds = array<i64: 112, 31>}, {transform_indices = @transform_2, window_bounds = array<i64: 128, 30>}]} {
    %c0 = arith.constant 0 : index
    %c0_0 = arith.constant 0 : index
    %0 = vector.load %arg1[%c0, %c0_0] : memref<128x30xf32, #tpu.memory_space<vmem>>, vector<128x30xf32>
    %1 = tpu.transpose %0, [1, 0] : vector<128x30xf32> -> vector<30x128xf32>
    %c0_1 = arith.constant 0 : index
    %c0_2 = arith.constant 0 : index
    %2 = vector.load %arg2[%c0_1, %c0_2] : memref<112x31xf32, #tpu.memory_space<vmem>>, vector<20x30xf32>
    %c0_3 = arith.constant 0 : index
    %c30 = arith.constant 30 : index
    %3 = vector.load %arg2[%c0_3, %c30] : memref<112x31xf32, #tpu.memory_space<vmem>>, vector<20x1xf32>
    %cst = arith.constant dense<0.000000e+00> : vector<20x128xf32>
    %4 = tpu.matmul %2, %1, %cst {dimension_numbers = #tpu.dot_dimension_numbers<[1], [0], [0], [1], [0, 0, 1, 1], [], []>} : vector<20x30xf32>, vector<30x128xf32>, vector<20x128xf32> -> vector<20x128xf32>
    %5 = vector.broadcast %3 : vector<20x1xf32> to vector<20x128xf32>
    %6 = arith.addf %4, %5 : vector<20x128xf32>
    %cst_4 = arith.constant 0.000000e+00 : f32
    %7 = vector.broadcast %cst_4 : f32 to vector<20x128xf32>
    %8 = arith.maximumf %6, %7 : vector<20x128xf32>
    %c24 = arith.constant 24 : index
    %c0_5 = arith.constant 0 : index
    %9 = vector.load %arg2[%c24, %c0_5] : memref<112x31xf32, #tpu.memory_space<vmem>>, vector<10x20xf32>
    %c24_6 = arith.constant 24 : index
    %c30_7 = arith.constant 30 : index
    %10 = vector.load %arg2[%c24_6, %c30_7] : memref<112x31xf32, #tpu.memory_space<vmem>>, vector<10x1xf32>
    %cst_8 = arith.constant dense<0.000000e+00> : vector<10x128xf32>
    %11 = tpu.matmul %9, %8, %cst_8 {dimension_numbers = #tpu.dot_dimension_numbers<[1], [0], [0], [1], [0, 0, 1, 1], [], []>} : vector<10x20xf32>, vector<20x128xf32>, vector<10x128xf32> -> vector<10x128xf32>
    %12 = vector.broadcast %10 : vector<10x1xf32> to vector<10x128xf32>
    %13 = arith.addf %11, %12 : vector<10x128xf32>
    %cst_9 = arith.constant 0.000000e+00 : f32
    %14 = vector.broadcast %cst_9 : f32 to vector<10x128xf32>
    %15 = arith.maximumf %13, %14 : vector<10x128xf32>
    %c40 = arith.constant 40 : index
    %c0_10 = arith.constant 0 : index
    %16 = vector.load %arg2[%c40, %c0_10] : memref<112x31xf32, #tpu.memory_space<vmem>>, vector<10x10xf32>
    %c40_11 = arith.constant 40 : index
    %c30_12 = arith.constant 30 : index
    %17 = vector.load %arg2[%c40_11, %c30_12] : memref<112x31xf32, #tpu.memory_space<vmem>>, vector<10x1xf32>
    %cst_13 = arith.constant dense<0.000000e+00> : vector<10x128xf32>
    %18 = tpu.matmul %16, %15, %cst_13 {dimension_numbers = #tpu.dot_dimension_numbers<[1], [0], [0], [1], [0, 0, 1, 1], [], []>} : vector<10x10xf32>, vector<10x128xf32>, vector<10x128xf32> -> vector<10x128xf32>
    %19 = vector.broadcast %17 : vector<10x1xf32> to vector<10x128xf32>
    %20 = arith.addf %18, %19 : vector<10x128xf32>
    %cst_14 = arith.constant 0.000000e+00 : f32
    %21 = vector.broadcast %cst_14 : f32 to vector<10x128xf32>
    %22 = arith.maximumf %20, %21 : vector<10x128xf32>
    %c56 = arith.constant 56 : index
    %c0_15 = arith.constant 0 : index
    %23 = vector.load %arg2[%c56, %c0_15] : memref<112x31xf32, #tpu.memory_space<vmem>>, vector<20x10xf32>
    %c56_16 = arith.constant 56 : index
    %c30_17 = arith.constant 30 : index
    %24 = vector.load %arg2[%c56_16, %c30_17] : memref<112x31xf32, #tpu.memory_space<vmem>>, vector<20x1xf32>
    %cst_18 = arith.constant dense<0.000000e+00> : vector<20x128xf32>
    %25 = tpu.matmul %23, %22, %cst_18 {dimension_numbers = #tpu.dot_dimension_numbers<[1], [0], [0], [1], [0, 0, 1, 1], [], []>} : vector<20x10xf32>, vector<10x128xf32>, vector<20x128xf32> -> vector<20x128xf32>
    %26 = vector.broadcast %24 : vector<20x1xf32> to vector<20x128xf32>
    %27 = arith.addf %25, %26 : vector<20x128xf32>
    %cst_19 = arith.constant 0.000000e+00 : f32
    %28 = vector.broadcast %cst_19 : f32 to vector<20x128xf32>
    %29 = arith.maximumf %27, %28 : vector<20x128xf32>
    %c80 = arith.constant 80 : index
    %c0_20 = arith.constant 0 : index
    %30 = vector.load %arg2[%c80, %c0_20] : memref<112x31xf32, #tpu.memory_space<vmem>>, vector<30x20xf32>
    %c80_21 = arith.constant 80 : index
    %c30_22 = arith.constant 30 : index
    %31 = vector.load %arg2[%c80_21, %c30_22] : memref<112x31xf32, #tpu.memory_space<vmem>>, vector<30x1xf32>
    %cst_23 = arith.constant dense<0.000000e+00> : vector<30x128xf32>
    %32 = tpu.matmul %30, %29, %cst_23 {dimension_numbers = #tpu.dot_dimension_numbers<[1], [0], [0], [1], [0, 0, 1, 1], [], []>} : vector<30x20xf32>, vector<20x128xf32>, vector<30x128xf32> -> vector<30x128xf32>
    %33 = vector.broadcast %31 : vector<30x1xf32> to vector<30x128xf32>
    %34 = arith.addf %32, %33 : vector<30x128xf32>
    %35 = tpu.transpose %34, [1, 0] : vector<30x128xf32> -> vector<128x30xf32>
    %c0_24 = arith.constant 0 : index
    %c0_25 = arith.constant 0 : index
    %36 = vector.load %arg3[%c0_24, %c0_25] : memref<128x30xf32, #tpu.memory_space<vmem>>, vector<128x30xf32>
    tpu.vector_store %arg3[%c0_24, %c0_25], %35 {strides = array<i32>} : memref<128x30xf32, #tpu.memory_space<vmem>>, vector<128x30xf32>,
    return
  }
  func.func @transform_0(%arg0: i32) -> (i32, i32) {
    %c0_i32 = arith.constant 0 : i32
    %c0_i32_0 = arith.constant 0 : i32
    return %arg0, %c0_i32 : i32, i32
  }
  func.func @transform_1(%arg0: i32) -> (i32, i32) {
    %c0_i32 = arith.constant 0 : i32
    %c0_i32_0 = arith.constant 0 : i32
    %c0_i32_1 = arith.constant 0 : i32
    return %c0_i32, %c0_i32_0 : i32, i32
  }
  func.func @transform_2(%arg0: i32) -> (i32, i32) {
    %c0_i32 = arith.constant 0 : i32
    %c0_i32_0 = arith.constant 0 : i32
    return %arg0, %c0_i32 : i32, i32
  }
}

</mosaic_0001>

<bundles_post_ra>
// kernel: breast_cancer_ae_forward.1
= control target key start
LH: loop header
LB: loop body
LE: loop exit
PB: predicated region body
PF: predicated region fallthrough
CT: control target
= control target key end

     0   :  { %vm45_vm0 = vcmask 244736   ;;  %v874_v0 = vmov 0.0|0.0   ;;  %vm875_vm2 = vmmov 0   ;;  %v876_v4 = vmov 0.0   ;;  %s1163_s0 = inlined_call_operand.vmem [shape: f32[128,30], index: 0, kind: input, shape index: {}]   ;;  %s1164_s1 = inlined_call_operand.vmem [shape: f32[112,31], index: 1, kind: input, shape index: {}]   ;;  %s1165_s2 = inlined_call_operand.vmem [shape: f32[128,30], index: 2, kind: output, shape index: {}]  }
   0x1   :  { %817 = vmatprep.subr.bf16.mxu0 %v874_v0  ;;  %v11_v1 = vld [vmem:[%s1163_s0] sm:$0xff]  ;;  %v12_v2 = vld [vmem:[%s1163_s0 + $0x8] sm:$0xff]  ;;  %vm903_vm1 = vmpackc.low %vm45_vm0, %vm45_vm0  ;;  %767 = vmatprep.mubr.msk.f32.mxu0 %vm875_vm2, %v876_v4  ;;  %v877_v6 = vmov 30   ;;  %vm195_vm3 = vcmask 162816   ;;  %vm200_vm4 = vcmask 1043456   ;;  %vm293_vm5 = vcmask 80896  }
   0x2   :  { %v818_v5 = vpack.c.bf16 %v12_v2, %v11_v1  ;;  %872 = vset.pattern.permute.xlu0 %v877_v6  ;;  %873 = vset.pattern.permute.xlu1 %v877_v6  ;;  %v13_v7 = vld [vmem:[%s1163_s0 + $0x10] sm:$0xff]  ;;  %v14_v8 = vld [vmem:[%s1163_s0 + $0x18] sm:$0xff]  ;;  %v27_v9 = vld [vmem:[%s1164_s1] sm:$0xff]  ;;  %vm298_vm6 = vcmask 1041408   ;;  %vm878_vm7 = vmmov 1  }
   0x3   :  { %v924_v10 = vld [vmem:[%s1164_s1 + $0x10] sm:$0xf]  ;;  %32 = vperm.xlu0 %872, %v27_v9   ;;  %v822_v11 = vpack.c.bf16 %v14_v8, %v13_v7  ;;  %v183_v12 = vld [vmem:[%s1164_s1 + $0x18] sm:$0xff]  ;;  %v28_v13 = vld [vmem:[%s1164_s1 + $0x8] sm:$0xff] }
   0x4   :  { %820 = vmatpush3.bf16.xpose.msk.msra.mxu0 %vm903_vm1, %v818_v5  ;;  %42 = vperm.xlu1 %873, %v924_v10   ;;  %v938_v14 = vld [vmem:[%s1164_s1 + $0x20] sm:$0x3]  ;;  %v16_v16 = vld [vmem:[%s1163_s0 + $0x28] sm:$0xff]  ;;  %v956_v19 = vld [vmem:[%s1164_s1 + $0x30] sm:$0x3] }
   0x5   :  { %821 = vmatprep.subr.bf16.mxu0 %v874_v0  ;;  %v15_v15 = vld [vmem:[%s1163_s0 + $0x20] sm:$0xff]  ;;  %v950_v17 = vld [vmem:[%s1164_s1 + $0x28] sm:$0xff]  ;;  %v962_v20 = vld [vmem:[%s1164_s1 + $0x38] sm:$0xff]  ;;  %782 = vmatprep.mubr.msk.f32.mxu1 %vm195_vm3, %v183_v12 }
   0x6   :  { %v826_v18 = vpack.c.bf16 %v16_v16, %v15_v15  ;;  %v970_v21 = vld [vmem:[%s1164_s1 + $0x40] sm:$0xff]  ;;  %v17_v22 = vld [vmem:[%s1163_s0 + $0x30] sm:$0xff]  ;;  %v18_v23 = vld [vmem:[%s1163_s0 + $0x38] sm:$0xff] }
   0x7   :  { %37 = vperm.xlu0 %872, %v28_v13   ;;  %v983_v24 = vld [vmem:[%s1164_s1 + $0x48] sm:$0xf]  ;;  %v830_v25 = vpack.c.bf16 %v18_v23, %v17_v22  ;;  %v989_v26 = vld [vmem:[%s1164_s1 + $0x50] sm:$0xff]  ;;  %v995_v27 = vld [vmem:[%s1164_s1 + $0x58] sm:$0xff] }
   0x8   :  { %187 = vperm.xlu1 %873, %v183_v12   ;;  %v1003_v28 = vld [vmem:[%s1164_s1 + $0x60] sm:$0xff]  ;;  %v20_v30 = vld [vmem:[%s1163_s0 + $0x48] sm:$0xff]  ;;  %v21_v33 = vld [vmem:[%s1163_s0 + $0x50] sm:$0xff] }
   0x9   :  { %v19_v29 = vld [vmem:[%s1163_s0 + $0x40] sm:$0xff]  ;;  %v1016_v31 = vld [vmem:[%s1164_s1 + $0x68] sm:$0x3f]  ;;  %v22_v34 = vld [vmem:[%s1163_s0 + $0x58] sm:$0xff] }
   0xa   :  { %v834_v32 = vpack.c.bf16 %v20_v30, %v19_v29  ;;  %v838_v35 = vpack.c.bf16 %v22_v34, %v21_v33  ;;  %v23_v36 = vld [vmem:[%s1163_s0 + $0x60] sm:$0xff]  ;;  %v24_v37 = vld [vmem:[%s1163_s0 + $0x68] sm:$0xff]  ;;  %v25_v39 = vld [vmem:[%s1163_s0 + $0x70] sm:$0xff] }
   0xb   :  { %192 = vperm.xlu0 %872, %v938_v14   ;;  %v842_v38 = vpack.c.bf16 %v24_v37, %v23_v36  ;;  %v26_v40 = vld [vmem:[%s1163_s0 + $0x78] sm:$0xff]  ;;  %vm1064_vm8 = vmpackc.low %vm298_vm6, %vm878_vm7 }
   0xc   :  { %824 = vmatpush3.bf16.xpose.msk.msra.mxu0 %vm903_vm1, %v822_v11  ;;  %285 = vperm.xlu1 %873, %v950_v17   ;;  %v846_v41 = vpack.c.bf16 %v26_v40, %v25_v39 }
   0xd   :  { %825 = vmatprep.subr.bf16.mxu0 %v874_v0 }
   0xf   :  { %290 = vperm.xlu0 %872, %v956_v19  }
  0x10   :  { %384 = vperm.xlu1 %873, %v962_v20  }
  0x13   :  { %389 = vperm.xlu0 %872, %v970_v21  }
  0x14   :  { %828 = vmatpush3.bf16.xpose.msk.msra.mxu0 %vm903_vm1, %v826_v18  ;;  %394 = vperm.xlu1 %873, %v983_v24  }
  0x15   :  { %829 = vmatprep.subr.bf16.mxu0 %v874_v0 }
  0x17   :  { %495 = vperm.xlu0 %872, %v989_v26  }
  0x18   :  { %500 = vperm.xlu1 %873, %v995_v27  }
  0x1b   :  { %505 = vperm.xlu0 %872, %v1003_v28  }
  0x1c   :  { %832 = vmatpush3.bf16.xpose.msk.msra.mxu0 %vm903_vm1, %v830_v25  ;;  %510 = vperm.xlu1 %873, %v1016_v31  }
  0x1d   :  { %833 = vmatprep.subr.bf16.mxu0 %v874_v0 }
  0x24   :  { %836 = vmatpush3.bf16.xpose.msk.msra.mxu0 %vm903_vm1, %v834_v32 }
  0x25   :  { %837 = vmatprep.subr.bf16.mxu0 %v874_v0 }
  0x2c   :  { %840 = vmatpush3.bf16.xpose.msk.msra.mxu0 %vm903_vm1, %v838_v35 }
  0x2d   :  { %841 = vmatprep.subr.bf16.mxu0 %v874_v0 }
  0x34   :  { %844 = vmatpush3.bf16.xpose.msk.msra.mxu0 %vm903_vm1, %v842_v38 }
  0x35   :  { %845 = vmatprep.subr.bf16.mxu0 %v874_v0 }
  0x3c   :  { %848 = vmatpush3.bf16.xpose.msk.msra.mxu0 %vm903_vm1, %v846_v41 }
  0x43   :  { %768 = vmatmul.mubr.msk.f32.vlgmr.msra.gmra.mrb[0].mxu0 %vm45_vm0, %v27_v9 }
  0x44   :  { %770 = vmatprep.mubr.msk.f32.mxu0 %vm875_vm2, %v876_v4 }
  0x47   :  { %771 = vmatmul.mubr.msk.f32.gmra.mrb[2].mxu0 %vm45_vm0, %v28_v13 }
  0x48   :  { %773 = vmatprep.mubr.msk.f32.mxu0 %vm875_vm2, %v876_v4 }
  0x4b   :  { %774 = vmatmul.mubr.msk.f32.gmra.mrb[4].mxu0 %vm45_vm0, %v924_v10 }
  0x82   :  { %v33_v42 = vpop.permute.xlu0 %32 }
  0x83   :  { %v43_v52 = vpop.permute.xlu1 %42 }
  0x86   :  { %v38_v46 = vpop.permute.xlu0 %37 }
  0x87   :  { %v188_v60 = vpop.permute.xlu1 %187 }
  0x8a   :  { %v193_v58 = vpop.permute.xlu0 %192 }
  0x8b   :  { %v286_v8 = vpop.permute.xlu1 %285 }
  0x8e   :  { %v291_v6 = vpop.permute.xlu0 %290 }
  0x8f   :  { %v385_v16 = vpop.permute.xlu1 %384 }
  0x92   :  { %v390_v18 = vpop.permute.xlu0 %389 }
 0x116   :  { %v166_v43 = vpop.f32.mrb[0].mxu0 }
 0x117   :  { %v769_v44 = vpop.f32.mrb[1].mxu0  ;;  %v167_v45 = vadd.f32 %v166_v43, %v33_v42 }
 0x119   :  { %v180_v50 = vmax.f32 %v167_v45, 0.0 }
 0x11a   :  { %v171_v47 = vpop.f32.mrb[2].mxu0 }
 0x11b   :  { %v172_v48 = vadd.f32 %v171_v47, %v38_v46  ;;  %v772_v49 = vpop.f32.mrb[3].mxu0 }
 0x11d   :  { %v181_v51 = vmax.f32 %v172_v48, 0.0 }
 0x11e   :  { %v176_v53 = vpop.f32.mrb[4].mxu0 }
 0x11f   :  { %v177_v54 = vadd.f32 %v176_v53, %v43_v52  ;;  %v775_v55 = vpop.f32.mrb[5].mxu0  ;;  %v849_v56 = vpack.c.bf16 %v181_v51, %v180_v50 }
 0x121   :  { %v182_v57 = vmax.f32 %v177_v54, 0.0  ;;  %850 = vmatprep.subr.bf16.mxu1 %v849_v56 }
 0x122   :  { %852 = vmatpush3.bf16.msra.mxu1 %v849_v56 }
 0x123   :  { %780 = vmatprep.subr.msk.mxu1 %vm200_vm4, %v182_v57 }
 0x126   :  { %781 = vmatpush3.msk.msra.mxu1 %vm200_vm4, %v182_v57 }
 0x127   :  { %783 = vmatmul.mubr.msk.f32.vlgmr.msra.gmra.mrb[0].mxu1 %vm195_vm3, %v938_v14 }
 0x128   :  { %789 = vmatprep.mubr.msk.f32.mxu1 %vm293_vm5, %v950_v17 }
 0x1fa   :  { %v784_v59 = vpop.f32.mrb[0].mxu1 }
 0x1fb   :  { %v276_v61 = vadd.f32 %v784_v59, %v193_v58  ;;  %v270_v62 = vpop.f32.mrb[1].mxu1 }
 0x1fc   :  { %v271_v63 = vadd.f32 %v270_v62, %v188_v60 }
 0x1fd   :  { %v280_v1 = vmax.f32 %v276_v61, 0.0 }
 0x1fe   :  { %v279_v2 = vmax.f32 %v271_v63, 0.0 }
 0x200   :  { %v853_v5 = vpack.c.bf16 %v280_v1, %v279_v2 }
 0x202   :  { %855 = vmatprep.subr.msk.bf16.mxu1 %vm1064_vm8, %v853_v5 }
 0x203   :  { %858 = vmatpush3.bf16.msk.msra.mxu1 %vm1064_vm8, %v853_v5 }
 0x204   :  { %859 = vmatprep.subr.bf16.mxu1 %v874_v0 }
 0x206   :  { %790 = vmatmul.mubr.msk.f32.vlgmr.msra.gmra.mrb[2].mxu1 %vm293_vm5, %v956_v19 }
 0x207   :  { %796 = vmatprep.mubr.msk.f32.mxu1 %vm875_vm2, %v876_v4 }
 0x2d9   :  { %v791_v7 = vpop.f32.mrb[2].mxu1 }
 0x2da   :  { %v374_v9 = vadd.f32 %v791_v7, %v291_v6  ;;  %v368_v10 = vpop.f32.mrb[3].mxu1 }
 0x2db   :  { %v369_v11 = vadd.f32 %v368_v10, %v286_v8 }
 0x2dc   :  { %v378_v12 = vmax.f32 %v374_v9, 0.0 }
 0x2dd   :  { %v377_v13 = vmax.f32 %v369_v11, 0.0 }
 0x2df   :  { %v860_v14 = vpack.c.bf16 %v378_v12, %v377_v13 }
 0x2e1   :  { %862 = vmatpush3.bf16.msk.msra.mxu1 %vm1064_vm8, %v860_v14 }
 0x2e4   :  { %797 = vmatmul.mubr.msk.f32.vlgmr.msra.gmra.mrb[4].mxu1 %vm293_vm5, %v962_v20 }
 0x2e5   :  { %799 = vmatprep.mubr.msk.f32.mxu1 %vm875_vm2, %v876_v4 }
 0x2e8   :  { %800 = vmatmul.mubr.msk.f32.gmra.mrb[6].mxu1 %vm293_vm5, %v970_v21  ;;  %v395_v21 = vpop.permute.xlu1 %394 }
 0x2e9   :  { %802 = vmatprep.mubr.msk.f32.mxu1 %vm875_vm2, %v876_v4 }
 0x2ec   :  { %803 = vmatmul.mubr.msk.f32.gmra.mrb[8].mxu1 %vm293_vm5, %v983_v24  ;;  %v501_v37 = vpop.permute.xlu1 %500 }
 0x2ed   :  { %811 = vmatprep.mubr.msk.f32.mxu1 %vm195_vm3, %v989_v26  ;;  %v496_v26 = vpop.permute.xlu0 %495 }
 0x2f1   :  { %v506_v40 = vpop.permute.xlu0 %505 }
 0x3b7   :  { %v472_v0 = vpop.f32.mrb[4].mxu1 }
 0x3b8   :  { %v798_v15 = vpop.f32.mrb[5].mxu1  ;;  %v473_v17 = vadd.f32 %v472_v0, %v385_v16 }
 0x3ba   :  { %v486_v23 = vmax.f32 %v473_v17, 0.0 }
 0x3bb   :  { %v477_v19 = vpop.f32.mrb[6].mxu1 }
 0x3bc   :  { %v478_v20 = vadd.f32 %v477_v19, %v390_v18  ;;  %v801_v22 = vpop.f32.mrb[7].mxu1 }
 0x3be   :  { %v487_v25 = vmax.f32 %v478_v20, 0.0 }
 0x3bf   :  { %v482_v29 = vpop.f32.mrb[8].mxu1 }
 0x3c0   :  { %v863_v30 = vpack.c.bf16 %v487_v25, %v486_v23  ;;  %v483_v4 = vadd.f32 %v482_v29, %v395_v21  ;;  %v804_v32 = vpop.f32.mrb[9].mxu1 }
 0x3c2   :  { %v488_v33 = vmax.f32 %v483_v4, 0.0  ;;  %864 = vmatprep.subr.bf16.mxu1 %v863_v30 }
 0x3c3   :  { %866 = vmatpush3.bf16.msra.mxu1 %v863_v30 }
 0x3c4   :  { %809 = vmatprep.subr.msk.mxu1 %vm200_vm4, %v488_v33 }
 0x3c7   :  { %810 = vmatpush3.msk.msra.mxu1 %vm200_vm4, %v488_v33 }
 0x3c8   :  { %812 = vmatmul.mubr.msk.f32.vlgmr.msra.gmra.mrb[10].mxu1 %vm195_vm3, %v995_v27  ;;  %v511_v27 = vpop.permute.xlu1 %510 }
 0x3c9   :  { %814 = vmatprep.mubr.msk.f32.mxu1 %vm195_vm3, %v1003_v28 }
 0x3cc   :  { %815 = vmatmul.mubr.msk.f32.gmra.mrb[12].mxu1 %vm195_vm3, %v1016_v31 }
 0x49b   :  { %v813_v24 = vpop.f32.mrb[10].mxu1 }
 0x49c   :  { %v590_v34 = vpop.f32.mrb[11].mxu1  ;;  %v596_v39 = vadd.f32 %v813_v24, %v501_v37 }
 0x49d   :  { %v591_v35 = vadd.f32 %v590_v34, %v496_v26 }
 0x49f   :  { %v816_v36 = vpop.f32.mrb[12].mxu1  ;;  %609 = vxpose.xlu0.b32.start [1/4] (short) %v591_v35, 128 }
 0x4a0   :  { %v600_v38 = vpop.f32.mrb[13].mxu1  ;;  %v606_v42 = vadd.f32 %v816_v36, %v511_v27 }
 0x4a1   :  { %v601_v41 = vadd.f32 %v600_v38, %v506_v40 }
 0x4a3   :  { %610 = vxpose.xlu0.b32.cont [2/4] (short) %v596_v39, 128 }
 0x4a7   :  { %611 = vxpose.xlu0.b32.cont [3/4] (short) %v601_v41, 128 }
 0x4ab   :  { %612 = vxpose.xlu0.b32.end [4/4] (short) %v606_v42, 128 }
 0x51f   :  { %v625_v28 = vpop.trf.xlu0 }
 0x520   :  { %641 = vst.msk [vmem:[%s1165_s2] sm:$0xff] %vm45_vm0, %v625_v28 }
 0x523   :  { %v626_v31 = vpop.trf.xlu0 }
 0x524   :  { %642 = vst.msk [vmem:[%s1165_s2 + $0x8] sm:$0xff] %vm45_vm0, %v626_v31 }
 0x527   :  { %v627_v43 = vpop.trf.xlu0 }
 0x528   :  { %643 = vst.msk [vmem:[%s1165_s2 + $0x10] sm:$0xff] %vm45_vm0, %v627_v43 }
 0x52b   :  { %v628_v44 = vpop.trf.xlu0 }
 0x52c   :  { %644 = vst.msk [vmem:[%s1165_s2 + $0x18] sm:$0xff] %vm45_vm0, %v628_v44 }
 0x52f   :  { %v629_v45 = vpop.trf.xlu0 }
 0x530   :  { %645 = vst.msk [vmem:[%s1165_s2 + $0x20] sm:$0xff] %vm45_vm0, %v629_v45 }
 0x533   :  { %v630_v46 = vpop.trf.xlu0 }
 0x534   :  { %646 = vst.msk [vmem:[%s1165_s2 + $0x28] sm:$0xff] %vm45_vm0, %v630_v46 }
 0x537   :  { %v631_v47 = vpop.trf.xlu0 }
 0x538   :  { %647 = vst.msk [vmem:[%s1165_s2 + $0x30] sm:$0xff] %vm45_vm0, %v631_v47 }
 0x53b   :  { %v632_v48 = vpop.trf.xlu0 }
 0x53c   :  { %648 = vst.msk [vmem:[%s1165_s2 + $0x38] sm:$0xff] %vm45_vm0, %v632_v48 }
 0x53f   :  { %v633_v49 = vpop.trf.xlu0 }
 0x540   :  { %649 = vst.msk [vmem:[%s1165_s2 + $0x40] sm:$0xff] %vm45_vm0, %v633_v49 }
 0x543   :  { %v634_v50 = vpop.trf.xlu0 }
 0x544   :  { %650 = vst.msk [vmem:[%s1165_s2 + $0x48] sm:$0xff] %vm45_vm0, %v634_v50 }
 0x547   :  { %v635_v51 = vpop.trf.xlu0 }
 0x548   :  { %651 = vst.msk [vmem:[%s1165_s2 + $0x50] sm:$0xff] %vm45_vm0, %v635_v51 }
 0x54b   :  { %v636_v52 = vpop.trf.xlu0 }
 0x54c   :  { %652 = vst.msk [vmem:[%s1165_s2 + $0x58] sm:$0xff] %vm45_vm0, %v636_v52 }
 0x54f   :  { %v637_v53 = vpop.trf.xlu0 }
 0x550   :  { %653 = vst.msk [vmem:[%s1165_s2 + $0x60] sm:$0xff] %vm45_vm0, %v637_v53 }
 0x553   :  { %v638_v54 = vpop.trf.xlu0 }
 0x554   :  { %654 = vst.msk [vmem:[%s1165_s2 + $0x68] sm:$0xff] %vm45_vm0, %v638_v54 }
 0x557   :  { %v639_v55 = vpop.trf.xlu0 }
 0x558   :  { %655 = vst.msk [vmem:[%s1165_s2 + $0x70] sm:$0xff] %vm45_vm0, %v639_v55 }
 0x55b   :  { %v640_v56 = vpop.trf.xlu0 }
 0x55c   :  { %656 = vst.msk [vmem:[%s1165_s2 + $0x78] sm:$0xff] %vm45_vm0, %v640_v56 }

</bundles_post_ra>
